<compile_context>
chip_gen: v6e
topology: v6e:2x2x1
jax: 0.10.0
libtpu: 0.0.40
codegen_flags: <defaults>
</compile_context>

<pallas_src>
import functools

import jax
import jax.numpy as jnp
from jax.experimental import pallas as pl
from jax.experimental.pallas import tpu as pltpu


def _round_up(x, m):
    return (x + m - 1) // m * m


def _gather_tile(ids_ref, tab_hbm, buf_ref, sem, base):
    """DMA-gather tm rows (ids_ref[base:base+tm]) of the HBM table into VMEM."""
    tm = buf_ref.shape[0]

    # Issue all row copies first (they overlap), then wait.  All copies share one
    # DMA semaphore; each wait below matches exactly one issued copy of the same
    # size, so ordering does not matter.
    @pl.loop(0, tm)
    def _(t):
        row = ids_ref[base + t]
        pltpu.make_async_copy(tab_hbm.at[pl.ds(row, 1)],
                              buf_ref.at[pl.ds(t, 1)],
                              sem).start()

    @pl.loop(0, tm)
    def _(t):
        pltpu.make_async_copy(tab_hbm.at[pl.ds(0, 1)],
                              buf_ref.at[pl.ds(t, 1)],
                              sem).wait()


def _gather_proj_kernel(ids_ref, tab_hbm, proj_ref, out_ref, buf_ref, sem):
    """grid = (token_tiles,).  Row gather + deferred projection on the MXU
    (emb_scale already folded into proj_ref by the wrapper)."""
    tm = buf_ref.shape[0]
    base = pl.program_id(0) * tm
    _gather_tile(ids_ref, tab_hbm, buf_ref, sem, base)
    out_ref[...] = jnp.dot(buf_ref[...], proj_ref[...],
                           preferred_element_type=jnp.float32
                           ).astype(out_ref.dtype)


def _gather_scale_kernel(emb_scale, ids_ref, tab_hbm, out_ref, buf_ref, sem):
    """grid = (token_tiles,).  Row gather + emb_scale (identity projection)."""
    tm = buf_ref.shape[0]
    base = pl.program_id(0) * tm
    _gather_tile(ids_ref, tab_hbm, buf_ref, sem, base)
    out_ref[...] = (buf_ref[...].astype(jnp.float32) * emb_scale
                    ).astype(out_ref.dtype)


def adaptive_embedding_forward(inp, emb_table, emb_proj, d_proj, *,
                               tm=512, compute_dtype=None):
    """inp: (batch, seq) int32; emb_table: (n_token, d_embed);
    emb_proj: (d_proj, d_embed) or None; returns (batch, seq, d_proj) float32.

    compute_dtype=jnp.bfloat16 gathers/projects in bf16 (half the HBM bytes,
    native MXU path); default None keeps the table's own dtype (no per-call
    full-table cast)."""
    n_token, d_embed = emb_table.shape
    emb_scale = float(d_proj) ** 0.5
    batch, seq = inp.shape
    n = batch * seq

    table = emb_table if compute_dtype is None else emb_table.astype(compute_dtype)
    tdtype = table.dtype
    itemsize = jnp.dtype(tdtype).itemsize

    d_emb_pad = _round_up(d_embed, 128)
    d_out_pad = _round_up(d_proj, 128)
    if d_emb_pad != d_embed:
        # TODO(synk): in a real model store the table pre-padded (d_embed is
        # usually already a multiple of 128) so this per-call pad disappears.
        table = jnp.pad(table, ((0, 0), (0, d_emb_pad - d_embed)))

    # Token tiling: large tiles (few grid steps, cheap per-step overhead), but
    # keep >= 2 tiles so the "parallel" axis can feed both v7x TensorCores.
    tm = _round_up(max(8, min(tm, _round_up(n, 8))), 8)
    if _round_up(n, tm) // tm < 2 and n > 8:
        tm = _round_up((n + 1) // 2, 8)
    n_pad = _round_up(n, tm)

    # Padded token ids point at row 0 (a valid row) so gather DMAs stay in
    # bounds; the corresponding output rows are sliced off below.
    ids = inp.reshape(n).astype(jnp.int32)
    ids = jnp.pad(ids, (0, n_pad - n))

    grid = (n_pad // tm,)
    out_shape = jax.ShapeDtypeStruct((n_pad, d_out_pad), jnp.float32)
    out_spec = pl.BlockSpec((tm, d_out_pad), lambda i, ids_ref: (i, 0))
    scratch = [pltpu.VMEM((tm, d_emb_pad), tdtype),
               pltpu.SemaphoreType.DMA(())]

    # VMEM budget: double-buffered f32 output block + gather buffer + proj tile
    # (double-buffered by the pipeline).  Cap well under v7x's 64 MiB physical.
    vmem_est = (2 * tm * d_out_pad * 4
                + tm * d_emb_pad * itemsize
                + 2 * d_emb_pad * d_out_pad * itemsize)
    vmem_limit = int(min(48 * 1024 * 1024, max(2 * vmem_est, 8 * 1024 * 1024)))
    cparams = pltpu.CompilerParams(dimension_semantics=("parallel",),
                                   vmem_limit_bytes=vmem_limit)

    if emb_proj is not None:
        assert emb_proj.shape == (d_proj, d_embed)
        # Deferred projection: gather the narrow (d_embed) rows, matmul with a
        # VMEM-resident projection; emb_scale folded into the tiny proj matrix.
        proj = (emb_proj.astype(jnp.float32) * emb_scale).T.astype(tdtype)
        proj = jnp.pad(proj, ((0, d_emb_pad - d_embed), (0, d_out_pad - d_proj)))
        out_flat = pl.pallas_call(
            _gather_proj_kernel,
            out_shape=out_shape,
            grid_spec=pltpu.PrefetchScalarGridSpec(
                num_scalar_prefetch=1,
                grid=grid,
                in_specs=[
                    pl.BlockSpec(memory_space=pl.ANY),            # table in HBM
                    pl.BlockSpec((d_emb_pad, d_out_pad),
                                 lambda i, ids_ref: (0, 0)),      # proj, resident
                ],
                out_specs=out_spec,
                scratch_shapes=scratch,
            ),
            compiler_params=cparams,
        )(ids, table, proj)
    else:
        assert d_proj == d_embed
        out_flat = pl.pallas_call(
            functools.partial(_gather_scale_kernel, emb_scale),
            out_shape=out_shape,
            grid_spec=pltpu.PrefetchScalarGridSpec(
                num_scalar_prefetch=1,
                grid=grid,
                in_specs=[pl.BlockSpec(memory_space=pl.ANY)],     # table in HBM
                out_specs=out_spec,
                scratch_shapes=scratch,
            ),
            compiler_params=cparams,
        )(ids, table)

    return out_flat[:n, :d_proj].reshape(batch, seq, d_proj)


if __name__ == "__main__":
    # Small, module-consistent shapes (d_proj != d_embed -> projection path).
    n_token, d_embed, d_proj = 384, 32, 48
    batch, seq = 4, 64

    key = jax.random.PRNGKey(0)
    k_tab, k_proj, k_ids = jax.random.split(key, 3)

    emb_table = jax.random.normal(k_tab, (n_token, d_embed), dtype=jnp.float32)
    emb_proj = 0.01 * jax.random.normal(k_proj, (d_proj, d_embed), dtype=jnp.float32)
    inp = jax.random.randint(k_ids, (batch, seq), 0, n_token, dtype=jnp.int32)

    # --- projection path (d_proj != d_embed), f32 table ---
    out = adaptive_embedding_forward(inp, emb_table, emb_proj, d_proj)
    out = jax.block_until_ready(out)

    ref = emb_table[inp]                                            # embedding lookup
    ref = jnp.einsum("bsd,pd->bsp", ref, emb_proj,
                     precision=jax.lax.Precision.HIGHEST)           # F.linear
    ref = ref * (d_proj ** 0.5)                                     # emb_scale
    assert out.shape == (batch, seq, d_proj)
    assert jnp.allclose(out, ref, atol=1e-4, rtol=1e-4), \
        float(jnp.max(jnp.abs(out - ref)))

    # --- identity path (d_proj == d_embed, no projection) ---
    out2 = adaptive_embedding_forward(inp, emb_table, None, d_embed)
    out2 = jax.block_until_ready(out2)
    ref2 = emb_table[inp] * (d_embed ** 0.5)
    assert out2.shape == (batch, seq, d_embed)
    assert jnp.allclose(out2, ref2, atol=1e-4, rtol=1e-4)

    # --- bf16 gather/projection path (half the gathered bytes; looser tol) ---
    out3 = adaptive_embedding_forward(inp, emb_table, emb_proj, d_proj,
                                      compute_dtype=jnp.bfloat16)
    out3 = jax.block_until_ready(out3)
    assert jnp.allclose(out3, ref, atol=5e-2, rtol=5e-2)

    print("KERNEL_OK")
</pallas_src>

<mosaic_0001>
module attributes {stable_mosaic.version = 11 : i64} {
  func.func @_gather_proj_kernel(%arg0: i32, %arg1: memref<256xi32, #tpu.memory_space<smem>>, %arg2: memref<384x128xf32, #tpu.memory_space<any>>, %arg3: memref<128x128xf32, #tpu.memory_space<vmem>>, %arg4: memref<128x128xf32, #tpu.memory_space<vmem>>, %arg5: memref<128x128xf32, #tpu.memory_space<vmem>>, %arg6: memref<!tpu.dma_semaphore, #tpu.memory_space<semaphore_mem>>) attributes {dimension_semantics = [#tpu.dimension_semantics<parallel>], iteration_bounds = array<i64: 2>, scalar_prefetch = 1 : i64, scratch_operands = 2 : i64, tpu.core_type = #tpu.core_type<tc>, window_params = [{}, {pipeline_mode = #tpu.pipeline_mode<synchronous>, transform_indices = @transform_1, window_bounds = array<i64: 128, 128>}, {transform_indices = @transform_2, window_bounds = array<i64: 128, 128>}]} {
    %c128_i32 = arith.constant 128 : i32
    %0 = arith.muli %arg0, %c128_i32 : i32
    %c0_i32 = arith.constant 0 : i32
    %c128_i32_0 = arith.constant 128 : i32
    %1 = arith.addi %c0_i32, %c128_i32_0 : i32
    %c1_i32 = arith.constant 1 : i32
    scf.for %arg7 = %c0_i32 to %1 step %c1_i32  : i32 {
      %c1_i32_11 = arith.constant 1 : i32
      %7 = arith.muli %arg7, %c1_i32_11 : i32
      %c0_i32_12 = arith.constant 0 : i32
      %8 = arith.addi %c0_i32_12, %7 : i32
      %9 = arith.addi %0, %8 : i32
      %10 = arith.index_cast %9 : i32 to index
      %11 = memref.load %arg1[%10] : memref<256xi32, #tpu.memory_space<smem>>
      %c0_i32_13 = arith.constant 0 : i32
      %12 = tpu.memref_slice %arg2[%11, %c0_i32_13] : memref<384x128xf32, #tpu.memory_space<any>> -> memref<1x128xf32, #tpu.memory_space<any>>
      %c0_i32_14 = arith.constant 0 : i32
      %13 = tpu.memref_slice %arg5[%8, %c0_i32_14] : memref<128x128xf32, #tpu.memory_space<vmem>> -> memref<1x128xf32, #tpu.memory_space<vmem>>
      tpu.enqueue_dma source(%12 : memref<1x128xf32, #tpu.memory_space<any>>) target(%13 : memref<1x128xf32, #tpu.memory_space<vmem>>) target_semaphore(%arg6 : memref<!tpu.dma_semaphore, #tpu.memory_space<semaphore_mem>>)
    }
    %c128_i32_1 = arith.constant 128 : i32
    %c0_i32_2 = arith.constant 0 : i32
    %c128_i32_3 = arith.constant 128 : i32
    %2 = arith.addi %c0_i32_2, %c128_i32_3 : i32
    %c1_i32_4 = arith.constant 1 : i32
    scf.for %arg7 = %c0_i32_2 to %2 step %c1_i32_4  : i32 {
      %c1_i32_11 = arith.constant 1 : i32
      %7 = arith.muli %arg7, %c1_i32_11 : i32
      %c0_i32_12 = arith.constant 0 : i32
      %8 = arith.addi %c0_i32_12, %7 : i32
      %c0_i32_13 = arith.constant 0 : i32
      %c0_i32_14 = arith.constant 0 : i32
      %9 = tpu.memref_slice %arg2[%c0_i32_13, %c0_i32_14] : memref<384x128xf32, #tpu.memory_space<any>> -> memref<1x128xf32, #tpu.memory_space<any>>
      %c0_i32_15 = arith.constant 0 : i32
      %10 = tpu.memref_slice %arg5[%8, %c0_i32_15] : memref<128x128xf32, #tpu.memory_space<vmem>> -> memref<1x128xf32, #tpu.memory_space<vmem>>
      tpu.wait_dma2 semaphore(%arg6 : memref<!tpu.dma_semaphore, #tpu.memory_space<semaphore_mem>>) src(%9 : memref<1x128xf32, #tpu.memory_space<any>>) dst(%10 : memref<1x128xf32, #tpu.memory_space<vmem>>)
    }
    %c128_i32_5 = arith.constant 128 : i32
    %c0 = arith.constant 0 : index
    %c0_6 = arith.constant 0 : index
    %3 = vector.load %arg5[%c0, %c0_6] : memref<128x128xf32, #tpu.memory_space<vmem>>, vector<128x128xf32>
    %c0_7 = arith.constant 0 : index
    %c0_8 = arith.constant 0 : index
    %4 = vector.load %arg3[%c0_7, %c0_8] : memref<128x128xf32, #tpu.memory_space<vmem>>, vector<128x128xf32>
    %cst = arith.constant dense<0.000000e+00> : vector<128x128xf32>
    %5 = tpu.matmul %3, %4, %cst {dimension_numbers = #tpu.dot_dimension_numbers<[1], [0], [0], [1], [0, 0, 1, 1], [], []>} : vector<128x128xf32>, vector<128x128xf32>, vector<128x128xf32> -> vector<128x128xf32>
    %c0_9 = arith.constant 0 : index
    %c0_10 = arith.constant 0 : index
    %6 = vector.load %arg4[%c0_9, %c0_10] : memref<128x128xf32, #tpu.memory_space<vmem>>, vector<128x128xf32>
    tpu.vector_store %arg4[%c0_9, %c0_10], %5 {strides = array<i32>} : memref<128x128xf32, #tpu.memory_space<vmem>>, vector<128x128xf32>,
    return
  }
  func.func @transform_1(%arg0: i32, %arg1: memref<256xi32, #tpu.memory_space<smem>>) -> (i32, i32) {
    %c0_i32 = arith.constant 0 : i32
    %c0_i32_0 = arith.constant 0 : i32
    %c0_i32_1 = arith.constant 0 : i32
    return %c0_i32, %c0_i32_0 : i32, i32
  }
  func.func @transform_2(%arg0: i32, %arg1: memref<256xi32, #tpu.memory_space<smem>>) -> (i32, i32) {
    %c0_i32 = arith.constant 0 : i32
    %c0_i32_0 = arith.constant 0 : i32
    return %arg0, %c0_i32 : i32, i32
  }
}

</mosaic_0001>

<bundles_post_ra>
// kernel: tpu_custom_call.1
= control target key start
LH: loop header
LB: loop body
LE: loop exit
PB: predicated region body
PF: predicated region fallthrough
CT: control target
= control target key end

     0   :  { %s785_s12 = smov [#allocation5]   ;;  %s976_s0 = inlined_call_operand.hbm [shape: s32[256], index: 0, kind: input, shape index: {}]   ;;  %s977_s1 = inlined_call_operand.hbm [shape: f32[384,128], index: 1, kind: input, shape index: {}]   ;;  %s978_s2 = inlined_call_operand.hbm [shape: f32[128,128], index: 2, kind: input, shape index: {}]   ;;  %s979_s3 = inlined_call_operand.hbm [shape: f32[256,128], index: 3, kind: output, shape index: {}]  }
   0x1   :  { %9 = dma.hbm_to_smem %s976_s0, 32, %s785_s12, [#allocation4] }
   0x2   :  { %749 = dma.done.wait [#allocation4], 32 }
   0x3   :  { %750 = vsyncadd [#allocation4], 4294967264 }
   0x4   :  { %11 = sfence }
   0x5   :  { %12 = vsyncpa [#allocation7], 0 }
   0x6   :  { %13 = vsyncpa [#allocation8], 0 }
   0x7   :  { %15 = vsyncpa [#allocation8 + $0x1], 0  ;;  %s816_s15 = smov 0   ;;  %s818_s16 = smov 0  }
   0x8   :  { %s820_s17 = smov 0   ;;  %s822_s18 = smov 0  }
   0x9 LB: > { %s837_s0 = sadd.s32 4294967295, %s775_s18   ;;  %s437_s19 = sadd.s32 4294967294, %s775_s18   ;;  %s775_s18 = sphi %s822_s18, %s987_s18   ;;  %s771_s17 = sphi %s820_s17, %s986_s17   ;;  %s767_s16 = sphi %s818_s16, %s985_s16   ;;  %s763_s15 = sphi %s816_s15, %s984_s15  }
   0xa   : > { %s841_s20 = sadd.s32 1, %s775_s18   ;;  %s49_s21 = sadd.s32 1, %s771_s17 }
   0xb   : > { %s46_s22 = ssub.s32 %s775_s18, %s841_s20  ;;  %p59_p0 = scmp.ne.s32.totalorder %s771_s17, %s767_s16 }
   0xc   : > { %p47_p1 = scmp.eq.s32.totalorder %s46_s22, 0  ;;  %p60_p2 = scmp.eq.s32.totalorder %s837_s0, 1 }
   0xd   : > { %p65_p3 = scmp.ne.s32.totalorder %s767_s16, %s763_s15  ;;  %p66_p4 = scmp.eq.s32.totalorder %s437_s19, 1 }
   0xe   : > { %s852_s23 = scalar_select %p47_p1, %s771_s17, %s49_s21  }
   0xf   : > { %p854_p5 = por %p60_p2, %p59_p0  ;;  %p858_p6 = por %p66_p4, %p65_p3 }
  0x10   : > { %p438_p7 = scmp.ge.s32.totalorder %s775_s18, 1  ;;  %p73_p8 = scmp.lt.s32.totalorder %s775_s18, 3 }
  0x11   : > { %s981_s25 = scalar_select %p858_p6, 1, 0 }
  0x12   : > { %p586_p9 = scmp.eq.s32.totalorder %s837_s0, 0  ;;  %p865_p10 = pnand %p438_p7, %p73_p8 }
  0x13   : > { %s786_s27 = smov [#allocation6]  }
  0x14   : > { %s85_s28 = sshll.u32 %s786_s27, 4  ;;  %p578_p11 = pneg %p865_p10  ;;  %s86_s28 = int_to_ptr.vmem [resolvable:$true] %s85_s28 }
  0x15   : > { %s662_s29 = scalar_lea.vmem %s86_s28, 2048  ;;  %p670_p3 = scmp.lt.s32.totalorder %s86_s28, %s86_s28 }
  0x16   : > { %p579_p12 = pnand %p586_p9, %p578_p11  ;;  %p663_p0 = scmp.ne.s32.totalorder %s86_s28, %s662_s29 }
  0x17   : > { %p671_p4 = scmp.lt.s32.totalorder %s662_s29, %s662_s29 }
  0x18   : > { %p653_p13 = pneg %p579_p12 }
  0x19   : > { %p672_p6 = por %p671_p4, %p670_p3 }
  0x1a   : > { %p665_p1 = pnand %p663_p0, %p653_p13 }
  0x1c   : > { %p666_p2 = pneg %p665_p1 }
  0x1e   : > { %p673_p7 = pnand %p672_p6, %p666_p2 }
  0x20   : > { %676 = shalt.err (!%p673_p7)
}
  0x21   : > { %s787_s30 = smov 128   ;;  %s788_s4 = smov 8  }
  0x22   : > { %581 = dma.hbm_to_vmem [thread:$0]  (!%p579_p12), %s978_s2, 2048, %s86_s28, [#allocation7], %s787_s30, %s787_s30, %s788_s4  }
  0x23   : > { %101 = sbr.rel (%p865_p10) target bundleno = 338 (0x152), region = 24 }
  0x28   : > { %752 = dma.done.wait (%p586_p9), [#allocation7], 2048  }
  0x29   : > { %754 = vsyncadd (%p586_p9), [#allocation7], 4294965248  ;;  %s113_s7 = sand.u32 1, %s767_s16   ;;  %s443_s8 = sshll.u32 %s837_s0, 7 }
  0x2a   : > { %s442_s9 = sshll.u32 %s113_s7, 7  ;;  %s888_s11 = smov 0  }
  0x2b   : > { %s886_s10 = scalar_lea.vmem [#allocation9], %s442_s9 }
  0x2c LB: >> { %s124_s12 = sadd.s32 %s779_s11, %s443_s8  ;;  %s128_s14 = scalar_lea.vmem [#allocation2], %s779_s11  ;;  %s779_s11 = sphi %s888_s11, %s123_s11  }
  0x2d   : >> { %s125_s13 = sld [smem:[#allocation5 + %s124_s12]]  ;;  %s136_s19 = sshll.u32 %s128_s14, 4  ;;  %s137_s19 = int_to_ptr.vmem [resolvable:$true] %s136_s19 }
  0x2e   : >> { %s679_s4 = scalar_lea.hbm %s977_s1, 6144 }
  0x33   : >> { %s444_s21 = sshll.u32 %s125_s13, 4 }
  0x34   : >> { %s127_s27 = scalar_lea.hbm %s977_s1, %s444_s21 }
  0x35   : >> { %s677_s28 = scalar_lea.hbm %s127_s27, 16  ;;  %p680_p8 = scmp.lt.s32.totalorder %s127_s27, %s977_s1 }
  0x36   : >> { %p678_p6 = scmp.ne.s32.totalorder %s127_s27, %s677_s28  ;;  %p681_p9 = scmp.lt.s32.totalorder %s679_s4, %s677_s28 }
  0x38   : >> { %p682_p10 = por %p681_p9, %p680_p8 }
  0x3a   : >> { %p683_p11 = pnand %p682_p10, %p678_p6 }
  0x3c   : >> { %686 = shalt.err (!%p683_p11)  }
  0x3d   : >> { %s687_s9 = scalar_lea.vmem %s137_s19, 16  ;;  %s789_s12 = smov [#allocation2]  }
  0x3e   : >> { %p688_p12 = scmp.ne.s32.totalorder %s137_s19, %s687_s9  ;;  %s689_s13 = sshll.u32 %s789_s12, 4  ;;  %s690_s13 = int_to_ptr.vmem [resolvable:$false] %s689_s13 }
  0x3f   : >> { %s691_s14 = scalar_lea.vmem %s690_s13, 2048  ;;  %p692_p13 = scmp.lt.s32.totalorder %s137_s19, %s690_s13 }
  0x40   : >> { %p693_p0 = scmp.lt.s32.totalorder %s691_s14, %s687_s9 }
  0x42   : >> { %p694_p1 = por %p693_p0, %p692_p13 }
  0x44   : >> { %p695_p2 = pnand %p694_p1, %p688_p12 }
  0x46   : >> { %698 = shalt.err (!%p695_p2)  }
  0x47   : >> { %139 = dma.hbm_to_vmem [thread:$0]  %s127_s27, 16, %s137_s19, [#allocation3] }
  0x48   : >> { %s123_s11 = sadd.s32 1, %s779_s11  }
  0x49   : >> { %p120_p3 = scmp.ge.s32.totalorder %s123_s11, 128  }
  0x4a   : > { %s781_s21 = smov (%p120_p3), 0  }
  0x4b   : > { %122 = sbr.rel (!%p120_p3) target bundleno = 44 (0x2c), region = 81 }
  0x50 LB: >> { %755 = dma.done.wait [#allocation3], 16  ;;  %s783_s21 = sphi %s781_s21, %s145_s21  }
  0x51   : >> { %756 = vsyncadd [#allocation3], 4294967280  ;;  %s145_s21 = sadd.s32 1, %s783_s21  }
  0x52   : >> { %p142_p4 = scmp.ge.s32.totalorder %s145_s21, 128  }
  0x53   : > { %v180_v0 = vld [vmem:[#allocation6 + $0x78] sm:$0xff] (%p142_p4)  ;;  %v179_v1 = vld [vmem:[#allocation6 + $0x70] sm:$0xff] (%p142_p4)  ;;  %v178_v2 = vld [vmem:[#allocation6 + $0x68] sm:$0xff] (%p142_p4)  ;;  %s451_s8 = sshll.u32 (%p142_p4), %s837_s0, 11  ;;  %s356_s11 = sshll.u32 (%p142_p4), %s886_s10, 4  ;;  %s928_s11 = int_to_ptr.vmem [resolvable:$true] %s356_s11 }
  0x54   : > { %144 = sbr.rel (!%p142_p4) target bundleno = 80 (0x50), region = 92  ;;  %484 = vmatprep.subr.mxu0 (%p142_p4), %v180_v0  ;;  %540 = vmatprep.subr.mxu1 (%p142_p4), %v180_v0  ;;  %v177_v3 = vld [vmem:[#allocation6 + $0x60] sm:$0xff] (%p142_p4)  ;;  %v176_v4 = vld [vmem:[#allocation6 + $0x58] sm:$0xff] (%p142_p4)  ;;  %v175_v5 = vld [vmem:[#allocation6 + $0x50] sm:$0xff] (%p142_p4)  ;;  %s926_s26 = scalar_lea.hbm (%p142_p4), %s979_s3, %s451_s8 }
  0x55   : > { %485 = vmatpush3.msra.mxu0 (%p142_p4), %v180_v0  ;;  %556 = vmatpush3.msra.mxu1 (%p142_p4), %v180_v0  ;;  %v174_v6 = vld [vmem:[#allocation6 + $0x48] sm:$0xff] (%p142_p4)  ;;  %v173_v7 = vld [vmem:[#allocation6 + $0x40] sm:$0xff] (%p142_p4)  ;;  %v172_v8 = vld [vmem:[#allocation6 + $0x38] sm:$0xff] (%p142_p4)  ;;  %s936_s0 = scalar_lea.sflag (%p142_p4), [#allocation8], %s113_s7  ;;  %s699_s27 = scalar_lea.vmem (%p142_p4), %s928_s11, 2048 }
  0x56   : > { %486 = vmatprep.subr.mxu0 (%p142_p4), %v179_v1  ;;  %541 = vmatprep.subr.mxu1 (%p142_p4), %v179_v1  ;;  %v171_v9 = vld [vmem:[#allocation6 + $0x30] sm:$0xff] (%p142_p4)  ;;  %v170_v10 = vld [vmem:[#allocation6 + $0x28] sm:$0xff] (%p142_p4)  ;;  %v169_v11 = vld [vmem:[#allocation6 + $0x20] sm:$0xff] (%p142_p4)  ;;  %p700_p7 = scmp.ne.s32.totalorder (%p142_p4), %s928_s11, %s699_s27  ;;  %s790_s28 = smov (%p142_p4), [#allocation9]  }
  0x57   : > { %487 = vmatpush3.msra.mxu0 (%p142_p4), %v179_v1  ;;  %557 = vmatpush3.msra.mxu1 (%p142_p4), %v179_v1  ;;  %v168_v12 = vld [vmem:[#allocation6 + $0x18] sm:$0xff] (%p142_p4)  ;;  %v167_v13 = vld [vmem:[#allocation6 + $0x10] sm:$0xff] (%p142_p4)  ;;  %v166_v14 = vld [vmem:[#allocation6 + $0x8] sm:$0xff] (%p142_p4)  ;;  %s703_s29 = sshll.u32 (%p142_p4), %s790_s28, 4  ;;  %s704_s29 = int_to_ptr.vmem [resolvable:$false] %s703_s29 }
  0x58   : > { %488 = vmatprep.subr.mxu0 (%p142_p4), %v178_v2  ;;  %542 = vmatprep.subr.mxu1 (%p142_p4), %v178_v2  ;;  %v165_v15 = vld [vmem:[#allocation6] sm:$0xff] (%p142_p4)  ;;  %v150_v18 = vld [vmem:[#allocation2 + $0x8] sm:$0xff] (%p142_p4)  ;;  %v151_v20 = vld [vmem:[#allocation2 + $0x10] sm:$0xff] (%p142_p4)  ;;  %p701_p6 = pnand (%p142_p4), %p700_p7, %p854_p5  ;;  %s705_s30 = scalar_lea.vmem (%p142_p4), %s704_s29, 4096 }
  0x59   : > { %489 = vmatpush3.msra.mxu0 %v178_v2  ;;  %558 = vmatpush3.msra.mxu1 %v178_v2  ;;  %v149_v16 = vld [vmem:[#allocation2] sm:$0xff]  ;;  %v158_v19 = vld [vmem:[#allocation2 + $0x48] sm:$0xff]  ;;  %v159_v21 = vld [vmem:[#allocation2 + $0x50] sm:$0xff]  ;;  %p706_p9 = scmp.lt.s32.totalorder %s928_s11, %s704_s29  ;;  %p707_p10 = scmp.lt.s32.totalorder %s705_s30, %s699_s27 }
  0x5a   : > { %490 = vmatprep.subr.mxu0 %v177_v3  ;;  %543 = vmatprep.subr.mxu1 %v177_v3  ;;  %v157_v17 = vld [vmem:[#allocation2 + $0x40] sm:$0xff]  ;;  %v152_v22 = vld [vmem:[#allocation2 + $0x18] sm:$0xff]  ;;  %v154_v26 = vld [vmem:[#allocation2 + $0x28] sm:$0xff]  ;;  %p702_p8 = pneg %p701_p6 }
  0x5b   : > { %491 = vmatpush3.msra.mxu0 %v177_v3  ;;  %559 = vmatpush3.msra.mxu1 %v177_v3  ;;  %v160_v23 = vld [vmem:[#allocation2 + $0x58] sm:$0xff]  ;;  %v153_v24 = vld [vmem:[#allocation2 + $0x20] sm:$0xff]  ;;  %v162_v27 = vld [vmem:[#allocation2 + $0x68] sm:$0xff]  ;;  %p708_p11 = por %p707_p10, %p706_p9 }
  0x5c   : > { %492 = vmatprep.subr.mxu0 %v176_v4  ;;  %544 = vmatprep.subr.mxu1 %v176_v4  ;;  %v161_v25 = vld [vmem:[#allocation2 + $0x60] sm:$0xff]  ;;  %v155_v28 = vld [vmem:[#allocation2 + $0x30] sm:$0xff]  ;;  %v156_v30 = vld [vmem:[#allocation2 + $0x38] sm:$0xff] }
  0x5d   : > { %493 = vmatpush3.msra.mxu0 %v176_v4  ;;  %560 = vmatpush3.msra.mxu1 %v176_v4  ;;  %v163_v29 = vld [vmem:[#allocation2 + $0x70] sm:$0xff]  ;;  %v164_v31 = vld [vmem:[#allocation2 + $0x78] sm:$0xff]  ;;  %p709_p12 = pnand %p708_p11, %p702_p8 }
  0x5e   : > { %494 = vmatprep.subr.mxu0 %v175_v5  ;;  %545 = vmatprep.subr.mxu1 %v175_v5 }
  0x5f   : > { %495 = vmatpush3.msra.mxu0 %v175_v5  ;;  %561 = vmatpush3.msra.mxu1 %v175_v5 }
  0x60   : > { %496 = vmatprep.subr.mxu0 %v174_v6  ;;  %546 = vmatprep.subr.mxu1 %v174_v6 }
  0x61   : > { %497 = vmatpush3.msra.mxu0 %v174_v6  ;;  %562 = vmatpush3.msra.mxu1 %v174_v6 }
  0x62   : > { %498 = vmatprep.subr.mxu0 %v173_v7  ;;  %547 = vmatprep.subr.mxu1 %v173_v7 }
  0x63   : > { %499 = vmatpush3.msra.mxu0 %v173_v7  ;;  %563 = vmatpush3.msra.mxu1 %v173_v7 }
  0x64   : > { %500 = vmatprep.subr.mxu0 %v172_v8  ;;  %548 = vmatprep.subr.mxu1 %v172_v8 }
  0x65   : > { %501 = vmatpush3.msra.mxu0 %v172_v8  ;;  %564 = vmatpush3.msra.mxu1 %v172_v8 }
  0x66   : > { %502 = vmatprep.subr.mxu0 %v171_v9  ;;  %549 = vmatprep.subr.mxu1 %v171_v9 }
  0x67   : > { %503 = vmatpush3.msra.mxu0 %v171_v9  ;;  %565 = vmatpush3.msra.mxu1 %v171_v9 }
  0x68   : > { %504 = vmatprep.subr.mxu0 %v170_v10  ;;  %550 = vmatprep.subr.mxu1 %v170_v10 }
  0x69   : > { %505 = vmatpush3.msra.mxu0 %v170_v10  ;;  %566 = vmatpush3.msra.mxu1 %v170_v10 }
  0x6a   : > { %506 = vmatprep.subr.mxu0 %v169_v11  ;;  %551 = vmatprep.subr.mxu1 %v169_v11 }
  0x6b   : > { %507 = vmatpush3.msra.mxu0 %v169_v11  ;;  %567 = vmatpush3.msra.mxu1 %v169_v11 }
  0x6c   : > { %508 = vmatprep.subr.mxu0 %v168_v12  ;;  %552 = vmatprep.subr.mxu1 %v168_v12 }
  0x6d   : > { %509 = vmatpush3.msra.mxu0 %v168_v12  ;;  %568 = vmatpush3.msra.mxu1 %v168_v12 }
  0x6e   : > { %510 = vmatprep.subr.mxu0 %v167_v13  ;;  %553 = vmatprep.subr.mxu1 %v167_v13 }
  0x6f   : > { %511 = vmatpush3.msra.mxu0 %v167_v13  ;;  %569 = vmatpush3.msra.mxu1 %v167_v13 }
  0x70   : > { %512 = vmatprep.subr.mxu0 %v166_v14  ;;  %554 = vmatprep.subr.mxu1 %v166_v14 }
  0x71   : > { %513 = vmatpush3.msra.mxu0 %v166_v14  ;;  %570 = vmatpush3.msra.mxu1 %v166_v14 }
  0x72   : > { %514 = vmatprep.subr.mxu0 %v165_v15  ;;  %555 = vmatprep.subr.mxu1 %v165_v15 }
  0x73   : > { %515 = vmatpush3.msra.mxu0 %v165_v15  ;;  %571 = vmatpush3.msra.mxu1 %v165_v15 }
  0x74   : > { %516 = vmatprep.mubr.f32.mxu0 %v149_v16  ;;  %528 = vmatprep.mubr.f32.mxu1 %v157_v17 }
  0x75   : > { %517 = vmatmul.mubr.f32.vlgmr.msra.gmra.mxu0 %v150_v18  ;;  %529 = vmatmul.mubr.f32.vlgmr.msra.gmra.mxu1 %v158_v19 }
  0x76   : > { %519 = vmatprep.mubr.f32.mxu0 %v151_v20  ;;  %531 = vmatprep.mubr.f32.mxu1 %v159_v21 }
  0x79   : > { %520 = vmatmul.mubr.f32.gmra.mxu0 %v152_v22  ;;  %532 = vmatmul.mubr.f32.gmra.mxu1 %v160_v23 }
  0x7a   : > { %522 = vmatprep.mubr.f32.mxu0 %v153_v24  ;;  %534 = vmatprep.mubr.f32.mxu1 %v161_v25 }
  0x7d   : > { %523 = vmatmul.mubr.f32.gmra.mxu0 %v154_v26  ;;  %535 = vmatmul.mubr.f32.gmra.mxu1 %v162_v27 }
  0x7e   : > { %525 = vmatprep.mubr.f32.mxu0 %v155_v28  ;;  %537 = vmatprep.mubr.f32.mxu1 %v163_v29 }
  0x81   : > { %526 = vmatmul.mubr.f32.gmra.mxu0 %v156_v30  ;;  %538 = vmatmul.mubr.f32.gmra.mxu1 %v164_v31 }
 0x135   : > { %v518_v32 = vpop.f32.mrf.mxu0  ;;  %v530_v33 = vpop.f32.mrf.mxu1 }
 0x136   : > { %327 = vst [vmem:[%s886_s10 + $0x8] sm:$0xff] %v518_v32  ;;  %335 = vst [vmem:[%s886_s10 + $0x48] sm:$0xff] %v530_v33 }
 0x137   : > { %v247_v34 = vpop.f32.mrf.mxu0  ;;  %v287_v35 = vpop.f32.mrf.mxu1 }
 0x138   : > { %326 = vst [vmem:[%s886_s10] sm:$0xff] %v247_v34  ;;  %334 = vst [vmem:[%s886_s10 + $0x40] sm:$0xff] %v287_v35 }
 0x139   : > { %v521_v36 = vpop.f32.mrf.mxu0  ;;  %v533_v37 = vpop.f32.mrf.mxu1 }
 0x13a   : > { %329 = vst [vmem:[%s886_s10 + $0x18] sm:$0xff] %v521_v36  ;;  %337 = vst [vmem:[%s886_s10 + $0x58] sm:$0xff] %v533_v37 }
 0x13b   : > { %v257_v38 = vpop.f32.mrf.mxu0  ;;  %v297_v39 = vpop.f32.mrf.mxu1 }
 0x13c   : > { %328 = vst [vmem:[%s886_s10 + $0x10] sm:$0xff] %v257_v38  ;;  %336 = vst [vmem:[%s886_s10 + $0x50] sm:$0xff] %v297_v39 }
 0x13d   : > { %v524_v40 = vpop.f32.mrf.mxu0  ;;  %v536_v41 = vpop.f32.mrf.mxu1 }
 0x13e   : > { %331 = vst [vmem:[%s886_s10 + $0x28] sm:$0xff] %v524_v40  ;;  %339 = vst [vmem:[%s886_s10 + $0x68] sm:$0xff] %v536_v41 }
 0x13f   : > { %v267_v42 = vpop.f32.mrf.mxu0  ;;  %v307_v43 = vpop.f32.mrf.mxu1 }
 0x140   : > { %330 = vst [vmem:[%s886_s10 + $0x20] sm:$0xff] %v267_v42  ;;  %338 = vst [vmem:[%s886_s10 + $0x60] sm:$0xff] %v307_v43 }
 0x141   : > { %v527_v44 = vpop.f32.mrf.mxu0  ;;  %v539_v45 = vpop.f32.mrf.mxu1 }
 0x142   : > { %333 = vst [vmem:[%s886_s10 + $0x38] sm:$0xff] %v527_v44  ;;  %341 = vst [vmem:[%s886_s10 + $0x78] sm:$0xff] %v539_v45 }
 0x143   : > { %v277_v46 = vpop.f32.mrf.mxu0  ;;  %v317_v47 = vpop.f32.mrf.mxu1 }
 0x144   : > { %332 = vst [vmem:[%s886_s10 + $0x30] sm:$0xff] %v277_v46  ;;  %340 = vst [vmem:[%s886_s10 + $0x70] sm:$0xff] %v317_v47 }
 0x145   : > { %712 = shalt.err (!%p709_p12)
}
 0x146   : > { %s713_s7 = scalar_lea.hbm %s926_s26, 2048  ;;  %s717_s5 = scalar_lea.hbm %s979_s3, 4096 }
 0x147   : > { %p714_p13 = scmp.ne.s32.totalorder %s926_s26, %s713_s7  ;;  %p718_p2 = scmp.lt.s32.totalorder %s926_s26, %s979_s3 }
 0x148   : > { %p719_p3 = scmp.lt.s32.totalorder %s717_s5, %s713_s7 }
 0x149   : > { %p715_p0 = pnand %p714_p13, %p854_p5 }
 0x14a   : > { %p720_p4 = por %p719_p3, %p718_p2 }
 0x14b   : > { %p716_p1 = pneg %p715_p0 }
 0x14d   : > { %p721_p7 = pnand %p720_p4, %p716_p1 }
 0x14f   : > { %724 = shalt.err (!%p721_p7)
}
 0x150   : > { %s791_s12 = smov 128   ;;  %s792_s13 = smov 8  }
 0x151   : > { %576 = dma.vmem_to_hbm [thread:$0]  (%p854_p5), %s928_s11, 2048, %s926_s26, %s936_s0, %s791_s12, %s791_s12, %s792_s13  }
 0x152 PF: > { %p588_p6 = scmp.ge.s32.totalorder %s775_s18, 2  ;;  %s371_s14 = sand.u32 1, %s763_s15  }
 0x153   : > { %p983_p8 = scmp.ne.s32.totalorder %s981_s25, 0  ;;  %s372_s21 = scalar_lea.sflag [#allocation8], %s371_s14 }
 0x155   : > { %p583_p9 = pnand %p588_p6, %p983_p8 }
 0x157   : > { %p584_p10 = pneg %p583_p9 }
 0x159   : > { %758 = dma.done.wait (%p584_p10), %s372_s21, 2048  }
 0x15a   : > { %760 = vsyncadd (%p584_p10), %s372_s21, 4294965248  ;;  %p18_p11 = scmp.ge.s32.totalorder %s841_s20, 4   ;;  %s984_s15 = smov %s767_s16 }
 0x15b   : > { %s985_s16 = smov %s771_s17  ;;  %s986_s17 = smov %s852_s23 }
 0x15c   : > { %s987_s18 = smov %s841_s20  ;;  %20 = sbr.rel (!%p18_p11) target bundleno = 9 (0x9), region = 103 }
 0x161   :  { %377 = vsyncpa [#allocation7], 1 }
 0x162   :  { %379 = vsyncpa [#allocation7 + $0x1], 1 }
 0x163   :  { %380 = vsyncpa [#allocation8], 1 }
 0x164   :  { %382 = vsyncpa [#allocation8 + $0x1], 1 }
 0x165   :  { %383 = vsyncmov [#allocation3] }
 0x168   :  { %s384_s18 = vpop.sfrf %383 }
 0x169   :  { %p450_p5 = scmp.ne.s32.totalorder %s384_s18, 0 }
 0x16b   :  { %388 = shalt.err (%p450_p5)  }

</bundles_post_ra>
